<compile_context>
chip_gen: v5e
topology: v5e:2x2
jax: 0.10.0
libtpu: 0.0.40
codegen_flags: <defaults>
</compile_context>

<pallas_src>
from functools import partial

import numpy as np
import jax
import jax.numpy as jnp
from jax import lax
from jax.experimental import pallas as pl
from jax.experimental.pallas import tpu as pltpu


# ----------------------------------------------------------------------------
# Trace-time constant builders (numpy, float64 internally)
# ----------------------------------------------------------------------------
def _gaussian_1d(kernel_size: int, sigma: float) -> np.ndarray:
    """Normalized 1D Gaussian.  outer(g, g) equals the PyTorch module's 2D kernel."""
    ax = np.arange(kernel_size, dtype=np.float64)
    mean = (kernel_size - 1) / 2.0
    g = np.exp(-((ax - mean) ** 2) / (2.0 * sigma ** 2))
    g = g / g.sum()
    return g.astype(np.float32)


def _nearest_indices(in_size: int, scale: float):
    """F.interpolate(mode='nearest', scale_factor=scale): src = floor(dst / scale)."""
    out_size = int(np.floor(in_size * scale))
    idx = np.floor(np.arange(out_size, dtype=np.float64) * (1.0 / scale)).astype(np.int64)
    idx = np.minimum(idx, in_size - 1)
    return idx, out_size


def _band_matrix(in_size: int, g: np.ndarray, ka: int, sel_idx: np.ndarray) -> np.ndarray:
    """Rows of the zero-padded 1D blur operator, selected at the nearest-neighbor
    output positions.  Result shape: (len(sel_idx), in_size)."""
    K = g.shape[0]
    A = np.zeros((in_size, in_size), dtype=np.float32)
    for i in range(in_size):
        for d in range(K):
            s = i + d - ka
            if 0 <= s < in_size:
                A[i, s] += g[d]
    return A[sel_idx, :]


# ----------------------------------------------------------------------------
# Pallas kernel: a chunk of planes, two MXU matmuls per plane
# ----------------------------------------------------------------------------
def _blur_downsample_kernel(bv_ref, bht_ref, x_ref, o_ref, *, planes, unroll):
    bv = bv_ref[...]     # (out_h, H)  f32, resident across the grid
    bht = bht_ref[...]   # (W, out_w)  f32, resident across the grid

    def body(p, carry):
        xp = x_ref[p]                                                     # (H, W)
        t = jnp.dot(bv, xp, preferred_element_type=jnp.float32)          # (out_h, W)
        o = jnp.dot(t, bht, preferred_element_type=jnp.float32)          # (out_h, out_w)
        o_ref[p] = o.astype(o_ref.dtype)
        return carry

    lax.fori_loop(0, planes, body, 0, unroll=unroll)


def anti_alias_interpolation2d(x: jax.Array, channels: int, scale: float) -> jax.Array:
    """Forward pass of AntiAliasInterpolation2d.  x: (N, C, H, W)."""
    if scale == 1.0:
        return x

    N, C, H, W = x.shape
    assert C == channels

    # Matches the PyTorch module's __init__ exactly (Python round on Python floats).
    sigma = (1.0 / scale - 1.0) / 2.0
    kernel_size = 2 * round(sigma * 4) + 1
    ka = kernel_size // 2          # kernel_size is always odd -> symmetric (ka, ka) pad

    g = _gaussian_1d(kernel_size, sigma)
    hi, out_h = _nearest_indices(H, scale)
    wi, out_w = _nearest_indices(W, scale)

    # Banded pad+blur+select matrices (trace-time constants, passed as VMEM inputs).
    bv = jnp.asarray(_band_matrix(H, g, ka, hi))         # (out_h, H)
    bht = jnp.asarray(_band_matrix(W, g, ka, wi).T)      # (W, out_w)

    # Flatten (N, C) -> planes and chunk them per grid step.
    P = N * C
    xs = x.reshape(P, H, W)

    itemsize = np.dtype(x.dtype).itemsize
    plane_bytes = (H * W + out_h * out_w) * itemsize
    budget = 2 * 1024 * 1024                     # per-block budget; ~8 MiB with dbl-buffering
    cap = int(max(1, min(P, budget // max(1, plane_bytes), 64)))
    tp = max(d for d in range(1, cap + 1) if P % d == 0)
    unroll = min(tp, 8)

    out = pl.pallas_call(
        partial(_blur_downsample_kernel, planes=tp, unroll=unroll),
        out_shape=jax.ShapeDtypeStruct((P, out_h, out_w), x.dtype),
        grid_spec=pltpu.PrefetchScalarGridSpec(
            num_scalar_prefetch=0,
            grid=(P // tp,),
            in_specs=[
                pl.BlockSpec((out_h, H), lambda i: (0, 0)),     # Bv   (resident)
                pl.BlockSpec((W, out_w), lambda i: (0, 0)),     # Bh^T (resident)
                pl.BlockSpec((tp, H, W), lambda i: (i, 0, 0)),  # plane chunk
            ],
            out_specs=pl.BlockSpec((tp, out_h, out_w), lambda i: (i, 0, 0)),
        ),
        compiler_params=pltpu.CompilerParams(
            dimension_semantics=("parallel",),
        ),
    )(bv, bht, xs)

    return out.reshape(N, C, out_h, out_w)


# ----------------------------------------------------------------------------
# Independent float64 numpy reference (pad -> depthwise KxK conv -> nearest)
# ----------------------------------------------------------------------------
def _reference_numpy(x: np.ndarray, channels: int, scale: float) -> np.ndarray:
    if scale == 1.0:
        return np.asarray(x)
    x = np.asarray(x, dtype=np.float64)
    N, C, H, W = x.shape
    sigma = (1.0 / scale - 1.0) / 2.0
    K = 2 * round(sigma * 4) + 1
    ka = K // 2
    kb = ka if K % 2 else ka - 1
    ax = np.arange(K, dtype=np.float64)
    mean = (K - 1) / 2.0
    g1 = np.exp(-((ax - mean) ** 2) / (2.0 * sigma ** 2))
    k2 = np.outer(g1, g1)
    k2 = k2 / k2.sum()
    xp = np.pad(x, ((0, 0), (0, 0), (ka, kb), (ka, kb)))
    out = np.zeros((N, C, H, W), dtype=np.float64)
    for dy in range(K):
        for dx in range(K):
            out += k2[dy, dx] * xp[:, :, dy:dy + H, dx:dx + W]
    hi, _ = _nearest_indices(H, scale)
    wi, _ = _nearest_indices(W, scale)
    return out[:, :, hi, :][:, :, :, wi]


if __name__ == "__main__":
    N, C, H, W = 2, 4, 16, 16
    scale = 0.5   # sigma = 0.5, kernel_size = 5, ka = kb = 2
    key = jax.random.PRNGKey(0)
    x = jax.random.normal(key, (N, C, H, W), dtype=jnp.float32)

    fn = jax.jit(partial(anti_alias_interpolation2d, channels=C, scale=scale))
    out = jax.block_until_ready(fn(x))

    ref = _reference_numpy(np.asarray(x), C, scale)
    assert out.shape == (N, C, int(H * scale), int(W * scale)), out.shape
    assert out.shape == ref.shape, (out.shape, ref.shape)
    # Tolerance covers possible reduced-precision MXU multiply passes while still
    # catching any structural error (normalization, padding, indexing).
    np.testing.assert_allclose(np.asarray(out, dtype=np.float64), ref, rtol=5e-3, atol=5e-3)

    print("KERNEL_OK")
</pallas_src>

<mosaic_0001>
module attributes {stable_mosaic.version = 11 : i64} {
  func.func @_blur_downsample_kernel(%arg0: i32, %arg1: memref<8x16xf32, #tpu.memory_space<vmem>>, %arg2: memref<16x8xf32, #tpu.memory_space<vmem>>, %arg3: memref<8x16x16xf32, #tpu.memory_space<vmem>>, %arg4: memref<8x8x8xf32, #tpu.memory_space<vmem>>) attributes {dimension_semantics = [#tpu.dimension_semantics<parallel>], iteration_bounds = array<i64: 1>, scalar_prefetch = 0 : i64, scratch_operands = 0 : i64, tpu.core_type = #tpu.core_type<tc>, window_params = [{pipeline_mode = #tpu.pipeline_mode<synchronous>, transform_indices = @transform_0, window_bounds = array<i64: 8, 16>}, {pipeline_mode = #tpu.pipeline_mode<synchronous>, transform_indices = @transform_1, window_bounds = array<i64: 16, 8>}, {transform_indices = @transform_2, window_bounds = array<i64: 8, 16, 16>}, {transform_indices = @transform_3, window_bounds = array<i64: 8, 8, 8>}]} {
    %c0 = arith.constant 0 : index
    %c0_0 = arith.constant 0 : index
    %0 = vector.load %arg1[%c0, %c0_0] : memref<8x16xf32, #tpu.memory_space<vmem>>, vector<8x16xf32>
    %c0_1 = arith.constant 0 : index
    %c0_2 = arith.constant 0 : index
    %1 = vector.load %arg2[%c0_1, %c0_2] : memref<16x8xf32, #tpu.memory_space<vmem>>, vector<16x8xf32>
    %c0_i32 = arith.constant 0 : i32
    %2 = arith.index_cast %c0_i32 : i32 to index
    %c0_3 = arith.constant 0 : index
    %c0_4 = arith.constant 0 : index
    %3 = vector.load %arg3[%2, %c0_3, %c0_4] : memref<8x16x16xf32, #tpu.memory_space<vmem>>, vector<1x16x16xf32>
    %4 = vector.shape_cast %3 : vector<1x16x16xf32> to vector<16x16xf32>
    %cst = arith.constant dense<0.000000e+00> : vector<8x16xf32>
    %5 = tpu.matmul %0, %4, %cst {dimension_numbers = #tpu.dot_dimension_numbers<[1], [0], [0], [1], [0, 0, 1, 1], [], []>} : vector<8x16xf32>, vector<16x16xf32>, vector<8x16xf32> -> vector<8x16xf32>
    %cst_5 = arith.constant dense<0.000000e+00> : vector<8x8xf32>
    %6 = tpu.matmul %5, %1, %cst_5 {dimension_numbers = #tpu.dot_dimension_numbers<[1], [0], [0], [1], [0, 0, 1, 1], [], []>} : vector<8x16xf32>, vector<16x8xf32>, vector<8x8xf32> -> vector<8x8xf32>
    %7 = arith.index_cast %c0_i32 : i32 to index
    %c0_6 = arith.constant 0 : index
    %c0_7 = arith.constant 0 : index
    %8 = vector.load %arg4[%7, %c0_6, %c0_7] : memref<8x8x8xf32, #tpu.memory_space<vmem>>, vector<1x8x8xf32>
    %9 = vector.shape_cast %8 : vector<1x8x8xf32> to vector<8x8xf32>
    %10 = vector.shape_cast %6 : vector<8x8xf32> to vector<1x8x8xf32>
    tpu.vector_store %arg4[%7, %c0_6, %c0_7], %10 {strides = array<i32>} : memref<8x8x8xf32, #tpu.memory_space<vmem>>, vector<1x8x8xf32>,
    %c1_i32 = arith.constant 1 : i32
    %11 = arith.index_cast %c1_i32 : i32 to index
    %c0_8 = arith.constant 0 : index
    %c0_9 = arith.constant 0 : index
    %12 = vector.load %arg3[%11, %c0_8, %c0_9] : memref<8x16x16xf32, #tpu.memory_space<vmem>>, vector<1x16x16xf32>
    %13 = vector.shape_cast %12 : vector<1x16x16xf32> to vector<16x16xf32>
    %cst_10 = arith.constant dense<0.000000e+00> : vector<8x16xf32>
    %14 = tpu.matmul %0, %13, %cst_10 {dimension_numbers = #tpu.dot_dimension_numbers<[1], [0], [0], [1], [0, 0, 1, 1], [], []>} : vector<8x16xf32>, vector<16x16xf32>, vector<8x16xf32> -> vector<8x16xf32>
    %cst_11 = arith.constant dense<0.000000e+00> : vector<8x8xf32>
    %15 = tpu.matmul %14, %1, %cst_11 {dimension_numbers = #tpu.dot_dimension_numbers<[1], [0], [0], [1], [0, 0, 1, 1], [], []>} : vector<8x16xf32>, vector<16x8xf32>, vector<8x8xf32> -> vector<8x8xf32>
    %16 = arith.index_cast %c1_i32 : i32 to index
    %c0_12 = arith.constant 0 : index
    %c0_13 = arith.constant 0 : index
    %17 = vector.load %arg4[%16, %c0_12, %c0_13] : memref<8x8x8xf32, #tpu.memory_space<vmem>>, vector<1x8x8xf32>
    %18 = vector.shape_cast %17 : vector<1x8x8xf32> to vector<8x8xf32>
    %19 = vector.shape_cast %15 : vector<8x8xf32> to vector<1x8x8xf32>
    tpu.vector_store %arg4[%16, %c0_12, %c0_13], %19 {strides = array<i32>} : memref<8x8x8xf32, #tpu.memory_space<vmem>>, vector<1x8x8xf32>,
    %c2_i32 = arith.constant 2 : i32
    %20 = arith.index_cast %c2_i32 : i32 to index
    %c0_14 = arith.constant 0 : index
    %c0_15 = arith.constant 0 : index
    %21 = vector.load %arg3[%20, %c0_14, %c0_15] : memref<8x16x16xf32, #tpu.memory_space<vmem>>, vector<1x16x16xf32>
    %22 = vector.shape_cast %21 : vector<1x16x16xf32> to vector<16x16xf32>
    %cst_16 = arith.constant dense<0.000000e+00> : vector<8x16xf32>
    %23 = tpu.matmul %0, %22, %cst_16 {dimension_numbers = #tpu.dot_dimension_numbers<[1], [0], [0], [1], [0, 0, 1, 1], [], []>} : vector<8x16xf32>, vector<16x16xf32>, vector<8x16xf32> -> vector<8x16xf32>
    %cst_17 = arith.constant dense<0.000000e+00> : vector<8x8xf32>
    %24 = tpu.matmul %23, %1, %cst_17 {dimension_numbers = #tpu.dot_dimension_numbers<[1], [0], [0], [1], [0, 0, 1, 1], [], []>} : vector<8x16xf32>, vector<16x8xf32>, vector<8x8xf32> -> vector<8x8xf32>
    %25 = arith.index_cast %c2_i32 : i32 to index
    %c0_18 = arith.constant 0 : index
    %c0_19 = arith.constant 0 : index
    %26 = vector.load %arg4[%25, %c0_18, %c0_19] : memref<8x8x8xf32, #tpu.memory_space<vmem>>, vector<1x8x8xf32>
    %27 = vector.shape_cast %26 : vector<1x8x8xf32> to vector<8x8xf32>
    %28 = vector.shape_cast %24 : vector<8x8xf32> to vector<1x8x8xf32>
    tpu.vector_store %arg4[%25, %c0_18, %c0_19], %28 {strides = array<i32>} : memref<8x8x8xf32, #tpu.memory_space<vmem>>, vector<1x8x8xf32>,
    %c3_i32 = arith.constant 3 : i32
    %29 = arith.index_cast %c3_i32 : i32 to index
    %c0_20 = arith.constant 0 : index
    %c0_21 = arith.constant 0 : index
    %30 = vector.load %arg3[%29, %c0_20, %c0_21] : memref<8x16x16xf32, #tpu.memory_space<vmem>>, vector<1x16x16xf32>
    %31 = vector.shape_cast %30 : vector<1x16x16xf32> to vector<16x16xf32>
    %cst_22 = arith.constant dense<0.000000e+00> : vector<8x16xf32>
    %32 = tpu.matmul %0, %31, %cst_22 {dimension_numbers = #tpu.dot_dimension_numbers<[1], [0], [0], [1], [0, 0, 1, 1], [], []>} : vector<8x16xf32>, vector<16x16xf32>, vector<8x16xf32> -> vector<8x16xf32>
    %cst_23 = arith.constant dense<0.000000e+00> : vector<8x8xf32>
    %33 = tpu.matmul %32, %1, %cst_23 {dimension_numbers = #tpu.dot_dimension_numbers<[1], [0], [0], [1], [0, 0, 1, 1], [], []>} : vector<8x16xf32>, vector<16x8xf32>, vector<8x8xf32> -> vector<8x8xf32>
    %34 = arith.index_cast %c3_i32 : i32 to index
    %c0_24 = arith.constant 0 : index
    %c0_25 = arith.constant 0 : index
    %35 = vector.load %arg4[%34, %c0_24, %c0_25] : memref<8x8x8xf32, #tpu.memory_space<vmem>>, vector<1x8x8xf32>
    %36 = vector.shape_cast %35 : vector<1x8x8xf32> to vector<8x8xf32>
    %37 = vector.shape_cast %33 : vector<8x8xf32> to vector<1x8x8xf32>
    tpu.vector_store %arg4[%34, %c0_24, %c0_25], %37 {strides = array<i32>} : memref<8x8x8xf32, #tpu.memory_space<vmem>>, vector<1x8x8xf32>,
    %c4_i32 = arith.constant 4 : i32
    %38 = arith.index_cast %c4_i32 : i32 to index
    %c0_26 = arith.constant 0 : index
    %c0_27 = arith.constant 0 : index
    %39 = vector.load %arg3[%38, %c0_26, %c0_27] : memref<8x16x16xf32, #tpu.memory_space<vmem>>, vector<1x16x16xf32>
    %40 = vector.shape_cast %39 : vector<1x16x16xf32> to vector<16x16xf32>
    %cst_28 = arith.constant dense<0.000000e+00> : vector<8x16xf32>
    %41 = tpu.matmul %0, %40, %cst_28 {dimension_numbers = #tpu.dot_dimension_numbers<[1], [0], [0], [1], [0, 0, 1, 1], [], []>} : vector<8x16xf32>, vector<16x16xf32>, vector<8x16xf32> -> vector<8x16xf32>
    %cst_29 = arith.constant dense<0.000000e+00> : vector<8x8xf32>
    %42 = tpu.matmul %41, %1, %cst_29 {dimension_numbers = #tpu.dot_dimension_numbers<[1], [0], [0], [1], [0, 0, 1, 1], [], []>} : vector<8x16xf32>, vector<16x8xf32>, vector<8x8xf32> -> vector<8x8xf32>
    %43 = arith.index_cast %c4_i32 : i32 to index
    %c0_30 = arith.constant 0 : index
    %c0_31 = arith.constant 0 : index
    %44 = vector.load %arg4[%43, %c0_30, %c0_31] : memref<8x8x8xf32, #tpu.memory_space<vmem>>, vector<1x8x8xf32>
    %45 = vector.shape_cast %44 : vector<1x8x8xf32> to vector<8x8xf32>
    %46 = vector.shape_cast %42 : vector<8x8xf32> to vector<1x8x8xf32>
    tpu.vector_store %arg4[%43, %c0_30, %c0_31], %46 {strides = array<i32>} : memref<8x8x8xf32, #tpu.memory_space<vmem>>, vector<1x8x8xf32>,
    %c5_i32 = arith.constant 5 : i32
    %47 = arith.index_cast %c5_i32 : i32 to index
    %c0_32 = arith.constant 0 : index
    %c0_33 = arith.constant 0 : index
    %48 = vector.load %arg3[%47, %c0_32, %c0_33] : memref<8x16x16xf32, #tpu.memory_space<vmem>>, vector<1x16x16xf32>
    %49 = vector.shape_cast %48 : vector<1x16x16xf32> to vector<16x16xf32>
    %cst_34 = arith.constant dense<0.000000e+00> : vector<8x16xf32>
    %50 = tpu.matmul %0, %49, %cst_34 {dimension_numbers = #tpu.dot_dimension_numbers<[1], [0], [0], [1], [0, 0, 1, 1], [], []>} : vector<8x16xf32>, vector<16x16xf32>, vector<8x16xf32> -> vector<8x16xf32>
    %cst_35 = arith.constant dense<0.000000e+00> : vector<8x8xf32>
    %51 = tpu.matmul %50, %1, %cst_35 {dimension_numbers = #tpu.dot_dimension_numbers<[1], [0], [0], [1], [0, 0, 1, 1], [], []>} : vector<8x16xf32>, vector<16x8xf32>, vector<8x8xf32> -> vector<8x8xf32>
    %52 = arith.index_cast %c5_i32 : i32 to index
    %c0_36 = arith.constant 0 : index
    %c0_37 = arith.constant 0 : index
    %53 = vector.load %arg4[%52, %c0_36, %c0_37] : memref<8x8x8xf32, #tpu.memory_space<vmem>>, vector<1x8x8xf32>
    %54 = vector.shape_cast %53 : vector<1x8x8xf32> to vector<8x8xf32>
    %55 = vector.shape_cast %51 : vector<8x8xf32> to vector<1x8x8xf32>
    tpu.vector_store %arg4[%52, %c0_36, %c0_37], %55 {strides = array<i32>} : memref<8x8x8xf32, #tpu.memory_space<vmem>>, vector<1x8x8xf32>,
    %c6_i32 = arith.constant 6 : i32
    %56 = arith.index_cast %c6_i32 : i32 to index
    %c0_38 = arith.constant 0 : index
    %c0_39 = arith.constant 0 : index
    %57 = vector.load %arg3[%56, %c0_38, %c0_39] : memref<8x16x16xf32, #tpu.memory_space<vmem>>, vector<1x16x16xf32>
    %58 = vector.shape_cast %57 : vector<1x16x16xf32> to vector<16x16xf32>
    %cst_40 = arith.constant dense<0.000000e+00> : vector<8x16xf32>
    %59 = tpu.matmul %0, %58, %cst_40 {dimension_numbers = #tpu.dot_dimension_numbers<[1], [0], [0], [1], [0, 0, 1, 1], [], []>} : vector<8x16xf32>, vector<16x16xf32>, vector<8x16xf32> -> vector<8x16xf32>
    %cst_41 = arith.constant dense<0.000000e+00> : vector<8x8xf32>
    %60 = tpu.matmul %59, %1, %cst_41 {dimension_numbers = #tpu.dot_dimension_numbers<[1], [0], [0], [1], [0, 0, 1, 1], [], []>} : vector<8x16xf32>, vector<16x8xf32>, vector<8x8xf32> -> vector<8x8xf32>
    %61 = arith.index_cast %c6_i32 : i32 to index
    %c0_42 = arith.constant 0 : index
    %c0_43 = arith.constant 0 : index
    %62 = vector.load %arg4[%61, %c0_42, %c0_43] : memref<8x8x8xf32, #tpu.memory_space<vmem>>, vector<1x8x8xf32>
    %63 = vector.shape_cast %62 : vector<1x8x8xf32> to vector<8x8xf32>
    %64 = vector.shape_cast %60 : vector<8x8xf32> to vector<1x8x8xf32>
    tpu.vector_store %arg4[%61, %c0_42, %c0_43], %64 {strides = array<i32>} : memref<8x8x8xf32, #tpu.memory_space<vmem>>, vector<1x8x8xf32>,
    %c7_i32 = arith.constant 7 : i32
    %65 = arith.index_cast %c7_i32 : i32 to index
    %c0_44 = arith.constant 0 : index
    %c0_45 = arith.constant 0 : index
    %66 = vector.load %arg3[%65, %c0_44, %c0_45] : memref<8x16x16xf32, #tpu.memory_space<vmem>>, vector<1x16x16xf32>
    %67 = vector.shape_cast %66 : vector<1x16x16xf32> to vector<16x16xf32>
    %cst_46 = arith.constant dense<0.000000e+00> : vector<8x16xf32>
    %68 = tpu.matmul %0, %67, %cst_46 {dimension_numbers = #tpu.dot_dimension_numbers<[1], [0], [0], [1], [0, 0, 1, 1], [], []>} : vector<8x16xf32>, vector<16x16xf32>, vector<8x16xf32> -> vector<8x16xf32>
    %cst_47 = arith.constant dense<0.000000e+00> : vector<8x8xf32>
    %69 = tpu.matmul %68, %1, %cst_47 {dimension_numbers = #tpu.dot_dimension_numbers<[1], [0], [0], [1], [0, 0, 1, 1], [], []>} : vector<8x16xf32>, vector<16x8xf32>, vector<8x8xf32> -> vector<8x8xf32>
    %70 = arith.index_cast %c7_i32 : i32 to index
    %c0_48 = arith.constant 0 : index
    %c0_49 = arith.constant 0 : index
    %71 = vector.load %arg4[%70, %c0_48, %c0_49] : memref<8x8x8xf32, #tpu.memory_space<vmem>>, vector<1x8x8xf32>
    %72 = vector.shape_cast %71 : vector<1x8x8xf32> to vector<8x8xf32>
    %73 = vector.shape_cast %69 : vector<8x8xf32> to vector<1x8x8xf32>
    tpu.vector_store %arg4[%70, %c0_48, %c0_49], %73 {strides = array<i32>} : memref<8x8x8xf32, #tpu.memory_space<vmem>>, vector<1x8x8xf32>,
    %c8_i32 = arith.constant 8 : i32
    return
  }
  func.func @transform_0(%arg0: i32) -> (i32, i32) {
    %c0_i32 = arith.constant 0 : i32
    %c0_i32_0 = arith.constant 0 : i32
    %c0_i32_1 = arith.constant 0 : i32
    return %c0_i32, %c0_i32_0 : i32, i32
  }
  func.func @transform_1(%arg0: i32) -> (i32, i32) {
    %c0_i32 = arith.constant 0 : i32
    %c0_i32_0 = arith.constant 0 : i32
    %c0_i32_1 = arith.constant 0 : i32
    return %c0_i32, %c0_i32_0 : i32, i32
  }
  func.func @transform_2(%arg0: i32) -> (i32, i32, i32) {
    %c0_i32 = arith.constant 0 : i32
    %c0_i32_0 = arith.constant 0 : i32
    %c0_i32_1 = arith.constant 0 : i32
    return %arg0, %c0_i32, %c0_i32_0 : i32, i32, i32
  }
  func.func @transform_3(%arg0: i32) -> (i32, i32, i32) {
    %c0_i32 = arith.constant 0 : i32
    %c0_i32_0 = arith.constant 0 : i32
    %c0_i32_1 = arith.constant 0 : i32
    return %arg0, %c0_i32, %c0_i32_0 : i32, i32, i32
  }
}

</mosaic_0001>

<bundles_post_ra>
// kernel: anti_alias_interpolation2d.1
= control target key start
LH: loop header
LB: loop body
LE: loop exit
PB: predicated region body
PF: predicated region fallthrough
CT: control target
= control target key end

     0   :  { %8 = vsyncpa [#allocation3], 0  ;;  %s665_s0 = inlined_call_operand.hbm [shape: f32[8,16], index: 0, kind: input, shape index: {}]   ;;  %s666_s1 = inlined_call_operand.hbm [shape: f32[16,8], index: 1, kind: input, shape index: {}]   ;;  %s667_s2 = inlined_call_operand.hbm [shape: f32[8,16,16], index: 2, kind: input, shape index: {}]   ;;  %s668_s3 = inlined_call_operand.hbm [shape: f32[8,8,8], index: 3, kind: output, shape index: {}]  }
   0x1   :  { %9 = vsyncpa [#allocation6], 0  ;;  %s26_s14 = sshll.u32 %s666_s1, 4  ;;  %s27_s14 = int_to_ptr.hbm [resolvable:$true] %s26_s14 }
   0x2   :  { %10 = vsyncpa [#allocation4], 0  ;;  %s594_s15 = smov [#allocation5]   ;;  %s16_s19 = sshll.u32 %s665_s0, 4  ;;  %s17_s19 = int_to_ptr.hbm [resolvable:$true] %s16_s19 }
   0x3   :  { %s28_s16 = sshll.u32 %s594_s15, 4  ;;  %s595_s20 = smov 128   ;;  %s29_s16 = int_to_ptr.vmem [resolvable:$true] %s28_s16 }
   0x4   :  { %s596_s21 = smov 8   ;;  %s597_s22 = smov [#allocation2]  }
   0x5   :  { %34 = dma.hbm_to_vmem [thread:$0]  %s27_s14, 256, %s29_s16, [#allocation6], %s595_s20, %s595_s20, %s596_s21  }
   0x6   :  { %s18_s23 = sshll.u32 %s597_s22, 4  ;;  %s39_s25 = sshll.u32 %s667_s2, 4  ;;  %s19_s23 = int_to_ptr.vmem [resolvable:$true] %s18_s23  ;;  %s40_s25 = int_to_ptr.hbm [resolvable:$true] %s39_s25 }
   0x7   :  { %21 = dma.hbm_to_vmem [thread:$0]  %s17_s19, 128, %s19_s23, [#allocation3]  }
   0x8   :  { %s598_s26 = smov [#allocation7]  }
   0x9   :  { %s41_s27 = sshll.u32 %s598_s26, 4  ;;  %s42_s27 = int_to_ptr.vmem [resolvable:$true] %s41_s27 }
   0xa   :  { %47 = dma.hbm_to_vmem [thread:$0]  %s40_s25, 2048, %s42_s27, [#allocation6], %s595_s20, %s595_s20, %s596_s21  }
   0xb   :  { %588 = dma.done.wait [#allocation3], 128  }
   0xc   :  { %589 = vsyncadd [#allocation3], 4294967168 }
   0xd   :  { %590 = dma.done.wait [#allocation6], 2304  }
   0xe   :  { %591 = vsyncadd [#allocation6], 4294964992  ;;  %v116_v0 = vld [vmem:[#allocation7 + $0x18] sm:$0xff]  ;;  %v115_v1 = vld [vmem:[#allocation7 + $0x10] sm:$0xff]  ;;  %vm65_vm0 = vcmask 130048   ;;  %vm112_vm1 = vcmask 64512  }
   0xf   :  { %131 = vmatpush.msra.mxu2 %v116_v0  ;;  %v60_v2 = vld [vmem:[#allocation2] sm:$0xff]  ;;  %v212_v3 = vld [vmem:[#allocation7 + $0x38] sm:$0xff]  ;;  %v63_v5 = vld [vmem:[#allocation7] sm:$0xff]  ;;  %s599_s0 = smov [#allocation8]   ;;  %s456_s30 = sshll.u32 %s668_s3, 4  ;;  %s457_s30 = int_to_ptr.hbm [resolvable:$true] %s456_s30 }
  0x10   :  { %v64_v4 = vld [vmem:[#allocation7 + $0x8] sm:$0xff]  ;;  %v211_v6 = vld [vmem:[#allocation7 + $0x30] sm:$0xff]  ;;  %v308_v8 = vld [vmem:[#allocation7 + $0x58] sm:$0xff]  ;;  %s454_s2 = sshll.u32 %s599_s0, 4  ;;  %s455_s2 = int_to_ptr.vmem [resolvable:$true] %s454_s2 }
  0x11   :  { %132 = vmatpush.msra.mxu2 %v115_v1  ;;  %83 = vmatpush.msra.mxu0 %v64_v4  ;;  %v164_v7 = vld [vmem:[#allocation7 + $0x28] sm:$0xff]  ;;  %v62_v9 = vld [vmem:[#allocation5 + $0x8] sm:$0xff]  ;;  %v163_v10 = vld [vmem:[#allocation7 + $0x20] sm:$0xff] }
  0x12   :  { %472 = vmatmul.msk.f32.vlgmr.msra.gmra.mxu2 %vm65_vm0, %v60_v2  ;;  %154 = vmatpush.msra.mxu3 %v62_v9  ;;  %v307_v11 = vld [vmem:[#allocation7 + $0x50] sm:$0xff]  ;;  %v260_v12 = vld [vmem:[#allocation7 + $0x48] sm:$0xff]  ;;  %v259_v13 = vld [vmem:[#allocation7 + $0x40] sm:$0xff] }
  0x13   :  { %227 = vmatpush.msrb.mxu2 %v212_v3  ;;  %84 = vmatpush.msra.mxu0 %v63_v5  ;;  %v404_v14 = vld [vmem:[#allocation7 + $0x78] sm:$0xff]  ;;  %v403_v15 = vld [vmem:[#allocation7 + $0x70] sm:$0xff]  ;;  %v356_v16 = vld [vmem:[#allocation7 + $0x68] sm:$0xff] }
  0x14   :  { %470 = vmatmul.msk.f32.vlgmr.msra.gmra.mxu0 %vm65_vm0, %v60_v2  ;;  %106 = vmatpush.msra.mxu1 %v62_v9  ;;  %v355_v17 = vld [vmem:[#allocation7 + $0x60] sm:$0xff]  ;;  %v61_v18 = vld [vmem:[#allocation5] sm:$0xff] }
  0x15   :  { %228 = vmatpush.msrb.mxu2 %v211_v6  ;;  %179 = vmatpush.msrb.mxu0 %v164_v7 }
  0x16   :  { %155 = vmatpush.msra.mxu3 %v61_v18  ;;  %107 = vmatpush.msra.mxu1 %v61_v18 }
  0x17   :  { %323 = vmatpush.msra.mxu2 %v308_v8  ;;  %180 = vmatpush.msrb.mxu0 %v163_v10 }
  0x18   :  { %250 = vmatpush.msrb.mxu3 %v62_v9  ;;  %202 = vmatpush.msrb.mxu1 %v62_v9 }
  0x19   :  { %324 = vmatpush.msra.mxu2 %v307_v11  ;;  %275 = vmatpush.msra.mxu0 %v260_v12 }
  0x1a   :  { %476 = vmatmul.msk.f32.vlgmr.msrb.gmra.mxu2 %vm65_vm0, %v60_v2  ;;  %251 = vmatpush.msrb.mxu3 %v61_v18 }
  0x1b   :  { %276 = vmatpush.msra.mxu0 %v259_v13  ;;  %419 = vmatpush.msrb.mxu2 %v404_v14 }
  0x1c   :  { %474 = vmatmul.msk.f32.vlgmr.msrb.gmra.mxu0 %vm65_vm0, %v60_v2  ;;  %203 = vmatpush.msrb.mxu1 %v61_v18 }
  0x1d   :  { %420 = vmatpush.msrb.mxu2 %v403_v15  ;;  %371 = vmatpush.msrb.mxu0 %v356_v16 }
  0x1f   :  { %372 = vmatpush.msrb.mxu0 %v355_v17 }
  0x22   :  { %480 = vmatmul.msk.f32.vlgmr.msra.gmra.mxu2 %vm65_vm0, %v60_v2 }
  0x24   :  { %478 = vmatmul.msk.f32.vlgmr.msra.gmra.mxu0 %vm65_vm0, %v60_v2 }
  0x2a   :  { %484 = vmatmul.msk.f32.vlgmr.msrb.gmra.mxu2 %vm65_vm0, %v60_v2 }
  0x2c   :  { %482 = vmatmul.msk.f32.vlgmr.msrb.gmra.mxu0 %vm65_vm0, %v60_v2 }
  0x91   :  { %v86_v19 = vpop.f32.mrf.mxu0 }
  0x92   :  { %471 = vmatmul.msk.f32.vlgmr.msra.gmra.mxu1 %vm65_vm0, %v86_v19 }
  0x93   :  { %298 = vmatpush.msra.mxu1 %v62_v9 }
  0x95   :  { %v134_v20 = vpop.f32.mrf.mxu2  ;;  %299 = vmatpush.msra.mxu1 %v61_v18 }
  0x96   :  { %473 = vmatmul.msk.f32.vlgmr.msra.gmra.mxu3 %vm65_vm0, %v134_v20 }
  0x97   :  { %346 = vmatpush.msra.mxu3 %v62_v9 }
  0x99   :  { %347 = vmatpush.msra.mxu3 %v61_v18  ;;  %v182_v21 = vpop.f32.mrf.mxu0 }
  0x9a   :  { %475 = vmatmul.msk.f32.vlgmr.msrb.gmra.mxu1 %vm65_vm0, %v182_v21 }
  0x9b   :  { %394 = vmatpush.msrb.mxu1 %v62_v9 }
  0x9d   :  { %v230_v22 = vpop.f32.mrf.mxu2  ;;  %395 = vmatpush.msrb.mxu1 %v61_v18 }
  0x9e   :  { %477 = vmatmul.msk.f32.vlgmr.msrb.gmra.mxu3 %vm65_vm0, %v230_v22 }
  0x9f   :  { %442 = vmatpush.msrb.mxu3 %v62_v9 }
  0xa1   :  { %443 = vmatpush.msrb.mxu3 %v61_v18  ;;  %v278_v23 = vpop.f32.mrf.mxu0 }
  0xa2   :  { %479 = vmatmul.msk.f32.vlgmr.msra.gmra.mxu1 %vm65_vm0, %v278_v23 }
  0xa5   :  { %v326_v24 = vpop.f32.mrf.mxu2 }
  0xa6   :  { %481 = vmatmul.msk.f32.vlgmr.msra.gmra.mxu3 %vm65_vm0, %v326_v24 }
  0xa9   :  { %v374_v25 = vpop.f32.mrf.mxu0 }
  0xaa   :  { %483 = vmatmul.msk.f32.vlgmr.msrb.gmra.mxu1 %vm65_vm0, %v374_v25 }
  0xad   :  { %v422_v26 = vpop.f32.mrf.mxu2 }
  0xae   :  { %485 = vmatmul.msk.f32.vlgmr.msrb.gmra.mxu3 %vm65_vm0, %v422_v26 }
 0x10f   :  { %v109_v27 = vpop.f32.mrf.mxu1 }
 0x110   :  { %113 = vst.msk [vmem:[#allocation8] sm:$0xff] %vm112_vm1, %v109_v27 }
 0x117   :  { %v205_v28 = vpop.f32.mrf.mxu1 }
 0x118   :  { %209 = vst.msk [vmem:[#allocation8 + $0x10] sm:$0xff] %vm112_vm1, %v205_v28 }
 0x119   :  { %v157_v29 = vpop.f32.mrf.mxu3 }
 0x11a   :  { %161 = vst.msk [vmem:[#allocation8 + $0x8] sm:$0xff] %vm112_vm1, %v157_v29 }
 0x11f   :  { %v301_v30 = vpop.f32.mrf.mxu1 }
 0x120   :  { %305 = vst.msk [vmem:[#allocation8 + $0x20] sm:$0xff] %vm112_vm1, %v301_v30 }
 0x121   :  { %v253_v31 = vpop.f32.mrf.mxu3 }
 0x122   :  { %257 = vst.msk [vmem:[#allocation8 + $0x18] sm:$0xff] %vm112_vm1, %v253_v31 }
 0x127   :  { %v397_v32 = vpop.f32.mrf.mxu1 }
 0x128   :  { %401 = vst.msk [vmem:[#allocation8 + $0x30] sm:$0xff] %vm112_vm1, %v397_v32 }
 0x129   :  { %v349_v33 = vpop.f32.mrf.mxu3 }
 0x12a   :  { %353 = vst.msk [vmem:[#allocation8 + $0x28] sm:$0xff] %vm112_vm1, %v349_v33 }
 0x131   :  { %v445_v34 = vpop.f32.mrf.mxu3 }
 0x132   :  { %449 = vst.msk [vmem:[#allocation8 + $0x38] sm:$0xff] %vm112_vm1, %v445_v34 }
 0x133   :  { %462 = dma.vmem_to_hbm [thread:$0]  %s455_s2, 1024, %s457_s30, [#allocation4], %s595_s20, %s595_s20, %s596_s21  }
 0x134   :  { %592 = dma.done.wait [#allocation4], 1024  }
 0x135   :  { %593 = vsyncadd [#allocation4], 4294966272 }
 0x136   :  { %467 = vsyncpa [#allocation3], 1 }
 0x137   :  { %468 = vsyncpa [#allocation6], 1 }
 0x138   :  { %469 = vsyncpa [#allocation4], 1 }

</bundles_post_ra>
